<compile_context>
chip_gen: v7x
topology: tpu7x:2x2x1
jax: 0.10.0
libtpu: 0.0.40
codegen_flags: <defaults>
</compile_context>

<pallas_src>
import functools
import math

import jax
import jax.numpy as jnp
from jax.experimental import pallas as pl
from jax.experimental.pallas import tpu as pltpu


def _make_positional_emb(seq_len, d_model, dtype=jnp.float32):
    """Deterministic sinusoidal table matching the PyTorch __init__ loops."""
    assert d_model % 2 == 0, "d_model must be even (sin/cos interleave)"
    pos = jnp.arange(seq_len, dtype=jnp.float32)[:, None]            # (S, 1)
    i_even = jnp.arange(0, d_model, 2, dtype=jnp.float32)[None, :]   # (1, D/2)
    div = jnp.power(10000.0, i_even / d_model)                       # 10000 ** (i / d_model)
    ang = pos / div                                                  # (S, D/2)
    pe = jnp.zeros((seq_len, d_model), dtype=jnp.float32)
    pe = pe.at[:, 0::2].set(jnp.sin(ang))
    pe = pe.at[:, 1::2].set(jnp.cos(ang))
    return pe.astype(dtype)


def _pe_kernel(x_ref, pe_ref, o_ref, *, scale):
    # Works for both layouts:
    #   aligned path: x_ref (TS, D),  pe_ref (TS, D)
    #   flat path:    x_ref (B, TC),  pe_ref (1, TC)   (sublane broadcast)
    # Add is done in f32 (pe stays f32 in VMEM), single cast on the store.
    x = x_ref[...].astype(jnp.float32)
    o_ref[...] = (x * scale + pe_ref[...]).astype(o_ref.dtype)


def _choose_seq_tile(S, D, itemsize, vmem_limit_bytes):
    """Row-tile for the D%128==0 path.

    Granularity is dtype-aware (8 rows f32, 16 bf16, 32 int8) so packed
    sub-32-bit rows stay vreg-aligned.  Budget: x + out (activation dtype) +
    pe (f32), double buffered, inside ~3/4 of the scoped VMEM request; the x
    block is additionally capped at ~4 MiB (bandwidth plateau on v6e).
    """
    gran = max(8, 32 // itemsize)
    per_row = D * (2 * itemsize + 4)                       # x + out + pe(f32)
    ts_vmem = (vmem_limit_bytes * 3 // 4) // (2 * per_row)  # double-buffered
    ts_blk = (4 * 1024 * 1024) // max(1, D * itemsize)      # ~4 MiB x-block cap
    ts = max(gran, min(ts_vmem, ts_blk))
    ts = max(gran, (ts // gran) * gran)
    return S if ts >= S else ts


def _choose_col_tile(B, total_cols, itemsize, vmem_limit_bytes):
    """Column-tile (multiple of 128) for the flattened lane-dense path."""
    per_col = B * 2 * itemsize + 4                          # x + out + pe(f32)
    tc_vmem = (vmem_limit_bytes * 3 // 4) // (2 * per_col)
    tc_blk = (4 * 1024 * 1024) // max(1, B * itemsize)
    tc = max(128, min(tc_vmem, tc_blk))
    tc = max(128, (tc // 128) * 128)
    return total_cols if tc >= total_cols else tc


def image_token_positional_encoding(x, positional_emb, d_model, *,
                                    seq_tile=None,
                                    vmem_limit_bytes=32 * 1024 * 1024,
                                    min_pallas_bytes=1 << 20,
                                    donate_input=False):
    """x: (B, S, D); positional_emb: (S, D).  Returns x*sqrt(d_model) + pe."""
    B, S, D = x.shape
    assert positional_emb.shape == (S, D), "positional_emb must be (seq_len, d_model)"
    assert d_model == D, "d_model must match the trailing dim of x"

    scale = float(math.sqrt(d_model))
    itemsize = jnp.dtype(x.dtype).itemsize
    pe = positional_emb.astype(jnp.float32)   # kept f32; add done in f32 in-kernel

    # Tiny inputs: grid-step + call overhead dominates; plain XLA is strictly
    # faster (and ideally this op would be fused into its producer/consumer).
    if min_pallas_bytes and B * S * D * itemsize < min_pallas_bytes:
        return (x.astype(jnp.float32) * scale + pe[None, :, :]).astype(x.dtype)

    cost = pl.CostEstimate(
        flops=2 * B * S * D,
        transcendentals=0,
        bytes_accessed=2 * B * S * D * itemsize + S * D * 4,
    )
    kernel = functools.partial(_pe_kernel, scale=scale)
    aliases = {0: 0} if donate_input else {}

    if D % 128 == 0:
        # Lane-aligned path: (S_tiles, B) grid, batch innermost so the pe tile
        # (block index depends only on the S-tile) stays VMEM-resident across
        # the whole batch loop.  cdiv handles non-divisible S via a masked
        # trailing block.
        TS = seq_tile if seq_tile is not None else _choose_seq_tile(
            S, D, itemsize, vmem_limit_bytes)
        TS = min(TS, S)
        n_s = pl.cdiv(S, TS)
        return pl.pallas_call(
            kernel,
            out_shape=jax.ShapeDtypeStruct((B, S, D), x.dtype),
            grid_spec=pltpu.PrefetchScalarGridSpec(
                num_scalar_prefetch=0,
                grid=(n_s, B),
                in_specs=[
                    pl.BlockSpec((None, TS, D), lambda s, b: (b, s, 0)),  # x, batch squeezed
                    pl.BlockSpec((TS, D), lambda s, b: (s, 0)),           # shared pe tile (f32)
                ],
                out_specs=pl.BlockSpec((None, TS, D), lambda s, b: (b, s, 0)),
            ),
            compiler_params=pltpu.CompilerParams(
                dimension_semantics=("parallel", "parallel"),
                vmem_limit_bytes=vmem_limit_bytes,
            ),
            cost_estimate=cost,
            input_output_aliases=aliases,
        )(x, pe)

    # Lane-dense path for D % 128 != 0: flatten (S, D) -> S*D (row-major, free
    # reshape) so the last dim is tiled in multiples of 128 and stores are
    # full-lane.  pe flat index matches x's flat index per batch row.
    total_cols = S * D
    x_flat = x.reshape(B, total_cols)
    pe_flat = pe.reshape(1, total_cols)
    TC = _choose_col_tile(B, total_cols, itemsize, vmem_limit_bytes)
    n_c = pl.cdiv(total_cols, TC)
    out_flat = pl.pallas_call(
        kernel,
        out_shape=jax.ShapeDtypeStruct((B, total_cols), x.dtype),
        grid_spec=pltpu.PrefetchScalarGridSpec(
            num_scalar_prefetch=0,
            grid=(n_c,),
            in_specs=[
                pl.BlockSpec((B, TC), lambda c: (0, c)),   # x slab, full batch
                pl.BlockSpec((1, TC), lambda c: (0, c)),   # pe row (f32), sublane-broadcast
            ],
            out_specs=pl.BlockSpec((B, TC), lambda c: (0, c)),
        ),
        compiler_params=pltpu.CompilerParams(
            dimension_semantics=("parallel",),
            vmem_limit_bytes=vmem_limit_bytes,
        ),
        cost_estimate=cost,
        input_output_aliases=aliases,
    )(x_flat, pe_flat)
    return out_flat.reshape(B, S, D)


if __name__ == "__main__":
    key = jax.random.PRNGKey(0)

    # 1) Module-sized demo shape (batch=2, seq=8, d_model=32): D % 128 != 0,
    #    exercises the flattened lane-dense path.  Force the Pallas path.
    B, S, D = 2, 8, 32
    x = jax.random.normal(key, (B, S, D), dtype=jnp.float32)
    pe = _make_positional_emb(S, D)
    out = jax.block_until_ready(
        image_token_positional_encoding(x, pe, d_model=D, min_pallas_bytes=0))
    ref = x * math.sqrt(D) + pe[None, :, :]
    assert out.shape == (B, S, D) and out.dtype == x.dtype
    assert jnp.allclose(out, ref, atol=1e-5, rtol=1e-5), "mismatch (flat lane-dense path)"

    # 2) Lane-aligned path (D=128), forced row tile -> (2, 2) grid.
    B2, S2, D2 = 2, 16, 128
    x2 = jax.random.normal(jax.random.PRNGKey(1), (B2, S2, D2), dtype=jnp.float32)
    pe2 = _make_positional_emb(S2, D2)
    out2 = jax.block_until_ready(
        image_token_positional_encoding(x2, pe2, d_model=D2, seq_tile=8,
                                        min_pallas_bytes=0))
    ref2 = x2 * math.sqrt(D2) + pe2[None, :, :]
    assert jnp.allclose(out2, ref2, atol=1e-5, rtol=1e-5), "mismatch (aligned path)"

    # 3) bf16 activations with S not a multiple of the tile -> cdiv partial
    #    trailing block; pe stays f32, add done in f32, one cast to bf16.
    B3, S3, D3 = 2, 40, 128
    x3 = jax.random.normal(jax.random.PRNGKey(2), (B3, S3, D3), dtype=jnp.bfloat16)
    pe3 = _make_positional_emb(S3, D3)
    out3 = jax.block_until_ready(
        image_token_positional_encoding(x3, pe3, d_model=D3, seq_tile=16,
                                        min_pallas_bytes=0))
    ref3 = (x3.astype(jnp.float32) * math.sqrt(D3) + pe3[None, :, :]).astype(jnp.bfloat16)
    assert out3.dtype == jnp.bfloat16
    assert jnp.allclose(out3.astype(jnp.float32), ref3.astype(jnp.float32),
                        atol=1e-2, rtol=1e-2), "mismatch (bf16 / partial tile)"

    # 4) Tiny-input fast path (plain XLA fallback, default threshold).
    out4 = jax.block_until_ready(image_token_positional_encoding(x, pe, d_model=D))
    assert jnp.allclose(out4, ref, atol=1e-5, rtol=1e-5), "mismatch (XLA fallback)"

    print("KERNEL_OK")
</pallas_src>

<mosaic_0001>
module attributes {stable_mosaic.version = 11 : i64} {
  func.func @_pe_kernel(%arg0: i32, %arg1: memref<2x256xf32, #tpu.memory_space<vmem>>, %arg2: memref<1x256xf32, #tpu.memory_space<vmem>>, %arg3: memref<2x256xf32, #tpu.memory_space<vmem>>) attributes {dimension_semantics = [#tpu.dimension_semantics<parallel>], iteration_bounds = array<i64: 1>, scalar_prefetch = 0 : i64, scratch_operands = 0 : i64, tpu.core_type = #tpu.core_type<tc>, window_params = [{transform_indices = @transform_0, window_bounds = array<i64: 2, 256>}, {transform_indices = @transform_1, window_bounds = array<i64: 1, 256>}, {transform_indices = @transform_2, window_bounds = array<i64: 2, 256>}]} {
    %c0 = arith.constant 0 : index
    %c0_0 = arith.constant 0 : index
    %0 = vector.load %arg1[%c0, %c0_0] : memref<2x256xf32, #tpu.memory_space<vmem>>, vector<2x256xf32>
    %cst = arith.constant 5.65685415 : f32
    %1 = vector.broadcast %cst : f32 to vector<2x256xf32>
    %2 = arith.mulf %0, %1 : vector<2x256xf32>
    %c0_1 = arith.constant 0 : index
    %c0_2 = arith.constant 0 : index
    %3 = vector.load %arg2[%c0_1, %c0_2] : memref<1x256xf32, #tpu.memory_space<vmem>>, vector<1x256xf32>
    %4 = vector.broadcast %3 : vector<1x256xf32> to vector<2x256xf32>
    %5 = arith.addf %2, %4 : vector<2x256xf32>
    %c0_3 = arith.constant 0 : index
    %c0_4 = arith.constant 0 : index
    %6 = vector.load %arg3[%c0_3, %c0_4] : memref<2x256xf32, #tpu.memory_space<vmem>>, vector<2x256xf32>
    tpu.vector_store %arg3[%c0_3, %c0_4], %5 {strides = array<i32>} : memref<2x256xf32, #tpu.memory_space<vmem>>, vector<2x256xf32>,
    return
  }
  func.func @transform_0(%arg0: i32) -> (i32, i32) {
    %c0_i32 = arith.constant 0 : i32
    %c0_i32_0 = arith.constant 0 : i32
    return %c0_i32, %arg0 : i32, i32
  }
  func.func @transform_1(%arg0: i32) -> (i32, i32) {
    %c0_i32 = arith.constant 0 : i32
    %c0_i32_0 = arith.constant 0 : i32
    return %c0_i32, %arg0 : i32, i32
  }
  func.func @transform_2(%arg0: i32) -> (i32, i32) {
    %c0_i32 = arith.constant 0 : i32
    %c0_i32_0 = arith.constant 0 : i32
    return %c0_i32, %arg0 : i32, i32
  }
}

</mosaic_0001>

<bundles_post_ra>
// kernel: tpu_custom_call.1
= control target key start
LH: loop header
LB: loop body
LE: loop exit
PB: predicated region body
PF: predicated region fallthrough
CT: control target
= control target key end

     0   :  { %7 = vsyncpa [#allocation3], 0  ;;  %s158_s0 = inlined_call_operand.hbm [shape: f32[2,256], index: 0, kind: input, shape index: {}]   ;;  %s159_s1 = inlined_call_operand.vmem [shape: f32[1,256], index: 1, kind: input, shape index: {}]   ;;  %s160_s2 = inlined_call_operand.hbm [shape: f32[2,256], index: 2, kind: output, shape index: {}]  }
   0x1   :  { %8 = vsyncpa [#allocation4], 0  ;;  %s113_s9 = smov [#allocation2]   ;;  %s65_s13 = scalar_lea.hbm %s158_s0, 64 }
   0x2   :  { %s15_s10 = sshll.u32 %s113_s9, 4  ;;  %p66_p0 = scmp.ne.s32.totalorder %s158_s0, %s65_s13  ;;  %s16_s10 = int_to_ptr.vmem [resolvable:$true] %s15_s10 }
   0x3   :  { %p69_p1 = scmp.lt.u32.totalorder %s65_s13, %s158_s0 }
   0x5   :  { %p71_p2 = pnand %p69_p1, %p66_p0 }
   0x7   :  { %74 = shalt.err (!%p71_p2)
}
   0x8   :  { %s75_s18 = scalar_lea.vmem %s16_s10, 64  ;;  %p80_p4 = scmp.lt.s32.totalorder %s16_s10, %s16_s10 }
   0x9   :  { %p76_p3 = scmp.ne.s32.totalorder %s16_s10, %s75_s18  ;;  %p81_p5 = scmp.lt.s32.totalorder %s75_s18, %s75_s18 }
   0xb   :  { %p82_p6 = por %p81_p5, %p80_p4 }
   0xd   :  { %p83_p7 = pnand %p82_p6, %p76_p3 }
   0xf   :  { %86 = shalt.err (!%p83_p7)
}
  0x10   :  { %18 = dma.hbm_to_vmem [thread:$0]  %s158_s0, 64, %s16_s10, [#allocation3]  }
  0x11   :  { %109 = dma.done.wait [#allocation3], 64  }
  0x12   :  { %110 = vsyncadd [#allocation3], 4294967232  ;;  %v28_v0 = vlaneseq  ;;  %v114_v1 = vmov 1983009808   ;;  %v24_v7 = vld [vmem:[#allocation2] sm:$0xf] }
  0x13   :  { %v38_v2 = vunpack.c.l.s4 %v114_v1  ;;  %v26_v8 = vld [vmem:[%s159_s1] sm:$0x3]  ;;  %v25_v12 = vmul.f32 5.656854, %v24_v7  ;;  %s115_s0 = smov [#allocation5]  }
  0x14   :  { %v29_v3 = vshrl.u32 %v28_v0, 7  ;;  %s53_s23 = sshll.u32 %s115_s0, 4  ;;  %s54_s23 = int_to_ptr.vmem [resolvable:$true] %s53_s23 }
  0x15   :  { %v39_v6 = vunpack.c.0.s8 %v38_v2  ;;  %s87_s24 = scalar_lea.vmem %s54_s23, 64  ;;  %p92_p9 = scmp.lt.s32.totalorder %s54_s23, %s54_s23 }
  0x16   :  { %v30_v4 = vsub.s32 0, %v29_v3  ;;  %v34_v5 = vsub.s32 1, %v29_v3  ;;  %p88_p8 = scmp.ne.s32.totalorder %s54_s23, %s87_s24  ;;  %p93_p10 = scmp.lt.s32.totalorder %s87_s24, %s87_s24 }
  0x17   :  { %v42_v11 = vsub.s32 %v39_v6, %v29_v3 }
  0x18   :  { %v31_v9 = vrot.slane %v26_v8, %v30_v4  ;;  %v35_v10 = vrot.slane %v26_v8, %v34_v5  ;;  %p94_p11 = por %p93_p10, %p92_p9 }
  0x1a   :  { %v36_v13 = vcombine.low %v31_v9, %v35_v10  ;;  %p95_p12 = pnand %p94_p11, %p88_p8 }
  0x1c   :  { %v43_v14 = vrot.slane %v36_v13, %v42_v11 }
  0x1e   :  { %v45_v15 = vadd.f32 %v43_v14, %v25_v12 }
  0x20   :  { %46 = vst [vmem:[#allocation5] sm:$0xf] %v45_v15 }
  0x21   :  { %98 = shalt.err (!%p95_p12)
}
  0x22   :  { %s99_s26 = scalar_lea.hbm %s160_s2, 64 }
  0x23   :  { %p100_p13 = scmp.ne.s32.totalorder %s160_s2, %s99_s26  ;;  %p103_p0 = scmp.lt.u32.totalorder %s99_s26, %s160_s2 }
  0x25   :  { %p105_p1 = pnand %p103_p0, %p100_p13 }
  0x27   :  { %108 = shalt.err (!%p105_p1)
}
  0x28   :  { %56 = dma.vmem_to_hbm [thread:$0]  %s54_s23, 64, %s160_s2, [#allocation4]  }
  0x29   :  { %111 = dma.done.wait [#allocation4], 64  }
  0x2a   :  { %112 = vsyncadd [#allocation4], 4294967232 }
  0x2b   :  { %60 = vsyncpa [#allocation3], 1 }
  0x2c   :  { %61 = vsyncpa [#allocation4], 1 }

</bundles_post_ra>
